<compile_context>
chip_gen: v6e
topology: v6e:2x2x1
jax: 0.10.0
libtpu: 0.0.40
codegen_flags: <defaults>
</compile_context>

<pallas_src>
import jax
import jax.numpy as jnp
from jax.experimental import pallas as pl
from jax.experimental.pallas import tpu as pltpu


def _round_up(x, m):
    return ((x + m - 1) // m) * m


def _vmem_capacity_bytes():
    try:
        info = pltpu.get_tpu_info()
        cap = getattr(info, "vmem_capacity_bytes", None)
        if cap:
            return int(cap)
    except Exception:
        pass
    return 64 << 20  # conservative fallback (v7x per-core VMEM)


def _fused_gram_kernel(i_tab, j_tab, k_tab, klast_tab, layer_tab,
                       ai_ref, aj_ref, out_ref, gacc_ref):
    """One work item = (layer, Gram tile (i, j) with j >= i, K block k).

    Grid is (core_stream, item). Within a (layer, i) group K is the outer loop
    and j the inner one, so ai_ref's block stays resident across the j sweep.

    ai_ref, aj_ref : (tm, tk) row-blocks i and j of the packed weight buffer
    out_ref        : (1, Lp, 128) f32 per-core slab; [0, l, 0] accumulates
                     ||G_l||^2 - 2*||W_l||^2
    gacc_ref       : (p_max, tm, tm) f32 panel of Gram-tile accumulators
    """
    c = pl.program_id(0)
    t = pl.program_id(1)
    ct = c * pl.num_programs(1) + t

    # Zero this core's output slab on its first work item.
    @pl.when(t == 0)
    def _():
        out_ref[...] = jnp.zeros_like(out_ref)

    lidx = layer_tab[ct]

    # Padding items (layer == -1) only exist to even out the two core streams.
    @pl.when(lidx >= 0)
    def _():
        ib = i_tab[ct]
        jb = j_tab[ct]
        kb = k_tab[ct]
        p = jb - ib                       # panel slot of Gram tile (i, j)

        # NT matmul on the MXU: G_ij += A_i(k) @ A_j(k)^T, f32 accumulation.
        prod = jax.lax.dot_general(
            ai_ref[...], aj_ref[...],
            dimension_numbers=(((1,), (1,)), ((), ())),
            preferred_element_type=jnp.float32)

        acc = jnp.where(kb == 0, prod, gacc_ref[p] + prod)
        gacc_ref[p] = acc

        # Gram tile complete after the last K block: fold it into the per-layer
        # partial sum  ||G_l||^2 - 2*||W_l||^2.  trace(G) over the diagonal
        # tiles equals ||W_l||_F^2 (trace identity); off-diagonal tiles count
        # twice by symmetry of G.
        @pl.when(klast_tab[ct] == 1)
        def _():
            gsq = jnp.sum(acc * acc)
            rr = jax.lax.broadcasted_iota(jnp.int32, acc.shape, 0)
            cc = jax.lax.broadcasted_iota(jnp.int32, acc.shape, 1)
            tr = jnp.sum(jnp.where(rr == cc, acc, 0.0))
            contrib = jnp.where(ib == jb, gsq - 2.0 * tr, 2.0 * gsq)

            lrow = jax.lax.broadcasted_iota(jnp.int32, out_ref.shape, 1)
            lcol = jax.lax.broadcasted_iota(jnp.int32, out_ref.shape, 2)
            slot = (lrow == lidx) & (lcol == 0)
            out_ref[...] += jnp.where(slot, contrib, 0.0)


def _gramian_bucket(layers, tm, tk):
    """One fused pallas_call for a same-dtype list of (A, M) layers.

    Returns sum_l sqrt(||A_l A_l^T||_F^2 - 2*||A_l||_F^2 + M_l).
    """
    num_layers = len(layers)
    dtype = layers[0][0].dtype
    itemsize = jnp.dtype(dtype).itemsize
    lp = _round_up(num_layers, 8)

    max_r = max(a.shape[0] for a, _ in layers)
    max_c = max(a.shape[1] for a, _ in layers)
    # Lane/sublane-aligned tiles (multiples of 128) keep the (tm, tm) Gram tile
    # lane-dense and the MXU full; clamp to the data so tiny buckets don't
    # over-pad. tm drives arithmetic intensity (~tm/itemsize flops/byte).
    tm_eff = max(128, min(_round_up(tm, 128), _round_up(max_r, 128)))
    tk_eff = max(128, min(_round_up(tk, 128), _round_up(max_c, 128)))

    budget = int(0.75 * _vmem_capacity_bytes())   # generation-aware VMEM cap

    def plan(tm_e, tk_e):
        metas, rows_total, cols_max, p_max = [], 0, 0, 1
        for a, m in layers:
            r, c = a.shape
            rp, cp = _round_up(r, tm_e), _round_up(c, tk_e)
            metas.append((rows_total // tm_e, rp // tm_e, cp // tk_e, m))
            rows_total += rp
            cols_max = max(cols_max, cp)
            p_max = max(p_max, rp // tm_e)
        need = (p_max * tm_e * tm_e * 4            # Gram-tile row panel
                + 2 * 2 * tm_e * tk_e * itemsize   # double-buffered input panels
                + 2 * lp * 128 * 4                 # output slabs
                + (2 << 20))                       # slack
        return metas, rows_total, cols_max, p_max, need

    metas, rows_total, cols_max, p_max, need = plan(tm_eff, tk_eff)
    while need > budget and (tm_eff > 128 or tk_eff > 128):
        if tm_eff > 128:
            tm_eff = max(128, (tm_eff // 2) // 128 * 128)
        else:
            tk_eff = max(128, (tk_eff // 2) // 128 * 128)
        metas, rows_total, cols_max, p_max, need = plan(tm_eff, tk_eff)

    # ---- pack this bucket into one row-blocked buffer (pad + concatenate) ----
    blocks = []
    for a, _ in layers:
        r, c = a.shape
        rp = _round_up(r, tm_eff)
        blocks.append(jnp.pad(a, ((0, rp - r), (0, cols_max - c))))
    packed = blocks[0] if len(blocks) == 1 else jnp.concatenate(blocks, axis=0)

    # ---- work items: (layer, row-block i) groups, K outer / j inner -----------
    groups = []
    for lidx, (rb0, nrb, nk, _) in enumerate(metas):
        for i in range(nrb):
            items = []
            for kb in range(nk):
                for j in range(i, nrb):          # symmetry: upper triangle only
                    items.append((rb0 + i, rb0 + j, kb,
                                  1 if kb == nk - 1 else 0, lidx))
            groups.append(items)

    # Greedy-balance whole groups across the two core streams (v7x megacore).
    streams = [[], []]
    for items in sorted(groups, key=len, reverse=True):
        tgt = 0 if len(streams[0]) <= len(streams[1]) else 1
        streams[tgt].extend(items)
    T = max(len(streams[0]), len(streams[1]), 1)
    pad_item = (0, 0, 0, 0, -1)                  # no-op item, skipped in kernel
    flat = []
    for s in streams:
        flat.extend(s)
        flat.extend([pad_item] * (T - len(s)))
    i_blk, j_blk, k_blk, klast, layer_id = (list(col) for col in zip(*flat))
    tabs = tuple(jnp.asarray(x, jnp.int32)
                 for x in (i_blk, j_blk, k_blk, klast, layer_id))

    vmem_limit = int(min(max(need + (4 << 20), 32 << 20), budget))
    vmem_limit = max(vmem_limit, int(need + (2 << 20)))

    out = pl.pallas_call(
        _fused_gram_kernel,
        out_shape=jax.ShapeDtypeStruct((2, lp, 128), jnp.float32),
        grid_spec=pltpu.PrefetchScalarGridSpec(
            num_scalar_prefetch=5,
            grid=(2, T),
            in_specs=[
                pl.BlockSpec((tm_eff, tk_eff),
                             lambda c, t, ib, jb, kb, kl, ly:
                                 (ib[c * T + t], kb[c * T + t])),
                pl.BlockSpec((tm_eff, tk_eff),
                             lambda c, t, ib, jb, kb, kl, ly:
                                 (jb[c * T + t], kb[c * T + t])),
            ],
            out_specs=pl.BlockSpec((1, lp, 128), lambda c, t, *_: (c, 0, 0)),
            scratch_shapes=[pltpu.VMEM((p_max, tm_eff, tm_eff), jnp.float32)],
        ),
        compiler_params=pltpu.CompilerParams(
            # Leading axis: per-TensorCore work stream (own output slab, no race).
            # Inner axis carries the Gram panel + per-layer sums -> sequential.
            dimension_semantics=("parallel", "arbitrary"),
            vmem_limit_bytes=vmem_limit,
        ),
    )(*tabs, packed, packed)

    sums = out[:, :num_layers, 0].sum(axis=0)    # ||G_l||^2 - 2*||W_l||^2
    m_vec = jnp.asarray([meta[3] for meta in metas], jnp.float32)
    return jnp.sum(jnp.sqrt(jnp.maximum(sums + m_vec, 0.0)))


def gramian_loss(model, *, tm=512, tk=512):
    """model: list of (kind, weight) pairs, kind in {"conv2d", "linear", "bn2d"}."""
    buckets = {}
    for kind, w in model:
        if kind == "bn2d":
            continue                     # BatchNorm2d is skipped in the torch module
        w = jnp.asarray(w)
        if kind == "conv2d":
            w2d = w.reshape(w.shape[0], -1)       # (C_out, C_in*KH*KW)
        elif kind == "linear":
            w2d = w                                # (out_features, in_features)
        else:
            # TODO(synk): generic modules with .weight (torch path g = w.T @ w) are
            # not represented in this synthetic model.
            continue
        m, k = w2d.shape
        # ||W W^T - I_M||_F^2 == ||A A^T||_F^2 - 2*||A||_F^2 + M for A in {W, W^T},
        # so run the Gram over the smaller dimension.
        a = w2d if m <= k else w2d.T
        buckets.setdefault(jnp.dtype(a.dtype).name, []).append((a, m))

    if not buckets:
        return jnp.float32(0.0)

    total = jnp.float32(0.0)
    for name in sorted(buckets):
        total = total + _gramian_bucket(buckets[name], tm, tk)
    return total


def gramian_loss_reference(model):
    loss = jnp.float32(0.0)
    for kind, w in model:
        if kind == "bn2d":
            continue
        if kind == "conv2d":
            w2d = jnp.asarray(w).reshape(w.shape[0], -1)
        elif kind == "linear":
            w2d = jnp.asarray(w)
        else:
            continue
        w2d = w2d.astype(jnp.float32)
        g = jnp.matmul(w2d, w2d.T, precision=jax.lax.Precision.HIGHEST)
        d = g - jnp.eye(g.shape[0], dtype=jnp.float32)
        loss = loss + jnp.sqrt(jnp.sum(d * d))
    return loss


if __name__ == "__main__":
    key = jax.random.PRNGKey(0)
    k1, k2, k3, k4, k5, k6 = jax.random.split(key, 6)

    # Deterministic synthetic "model":
    #   Conv2d(in=3, out=4, kernel=3x3)   -> weight (4, 3, 3, 3)   [OIHW]
    #   BatchNorm2d(4)                    -> weight (4,)           [skipped]
    #   Conv2d(in=8, out=64, kernel=1x1)  -> weight (64, 8, 1, 1)  [M > K path]
    #   Linear(in=256, out=16)            -> weight (16, 256)
    #   Linear(in=32, out=8)              -> weight (8, 32)
    #   Linear(in=260, out=200)           -> weight (200, 260)     [multi-tile path]
    #   Linear(in=48, out=24)  bf16       -> weight (24, 48)       [separate dtype bucket]
    conv1_w = 0.1 * jax.random.normal(k1, (4, 3, 3, 3), dtype=jnp.float32)
    bn_w = jnp.ones((4,), dtype=jnp.float32)
    conv2_w = 0.1 * jax.random.normal(k2, (64, 8, 1, 1), dtype=jnp.float32)
    lin1_w = 0.05 * jax.random.normal(k3, (16, 256), dtype=jnp.float32)
    lin2_w = 0.1 * jax.random.normal(k4, (8, 32), dtype=jnp.float32)
    lin3_w = 0.05 * jax.random.normal(k5, (200, 260), dtype=jnp.float32)
    lin4_w = (0.1 * jax.random.normal(k6, (24, 48), dtype=jnp.float32)).astype(jnp.bfloat16)

    model = [("conv2d", conv1_w), ("bn2d", bn_w), ("conv2d", conv2_w),
             ("linear", lin1_w), ("linear", lin2_w), ("linear", lin3_w),
             ("linear", lin4_w)]

    ref = jax.block_until_ready(gramian_loss_reference(model))

    # Default (large, lane-aligned) tiles ...
    loss_a = jax.block_until_ready(gramian_loss(model))
    # ... and small tiles to exercise the multi-row-block / multi-K panel path,
    # the off-diagonal 2x symmetry weighting, and the LHS-reuse ordering.
    loss_b = jax.block_until_ready(gramian_loss(model, tm=128, tk=128))

    assert jnp.allclose(loss_a, ref, rtol=1e-3, atol=1e-3), (loss_a, ref)
    assert jnp.allclose(loss_b, ref, rtol=1e-3, atol=1e-3), (loss_b, ref)
    print("KERNEL_OK")
</pallas_src>

<mosaic_0001>
module attributes {stable_mosaic.version = 11 : i64} {
  func.func @_fused_gram_kernel(%arg0: i32, %arg1: i32, %arg2: memref<2xi32, #tpu.memory_space<smem>>, %arg3: memref<2xi32, #tpu.memory_space<smem>>, %arg4: memref<2xi32, #tpu.memory_space<smem>>, %arg5: memref<2xi32, #tpu.memory_space<smem>>, %arg6: memref<2xi32, #tpu.memory_space<smem>>, %arg7: memref<128x128xbf16, #tpu.memory_space<vmem>>, %arg8: memref<128x128xbf16, #tpu.memory_space<vmem>>, %arg9: memref<1x8x128xf32, #tpu.memory_space<vmem>>, %arg10: memref<1x128x128xf32, #tpu.memory_space<vmem>>) attributes {dimension_semantics = [#tpu.dimension_semantics<parallel>, #tpu.dimension_semantics<arbitrary>], iteration_bounds = array<i64: 2, 1>, scalar_prefetch = 5 : i64, scratch_operands = 1 : i64, tpu.core_type = #tpu.core_type<tc>, window_params = [{transform_indices = @transform_0, window_bounds = array<i64: 128, 128>}, {transform_indices = @transform_1, window_bounds = array<i64: 128, 128>}, {transform_indices = @transform_2, window_bounds = array<i64: 1, 8, 128>}]} {
    %c1_i32 = arith.constant 1 : i32
    %0 = arith.muli %arg0, %c1_i32 : i32
    %1 = arith.addi %0, %arg1 : i32
    %c0_i32 = arith.constant 0 : i32
    %2 = arith.cmpi eq, %arg1, %c0_i32 : i32
    %3 = arith.extui %2 : i1 to i32
    %c0_i32_0 = arith.constant 0 : i32
    %4 = arith.cmpi ne, %3, %c0_i32_0 : i32
    scf.if %4 {
      %cst = arith.constant 0.000000e+00 : f32
      %10 = vector.broadcast %cst : f32 to vector<1x8x128xf32>
      %c0 = arith.constant 0 : index
      %c0_3 = arith.constant 0 : index
      %c0_4 = arith.constant 0 : index
      %11 = vector.load %arg9[%c0, %c0_3, %c0_4] : memref<1x8x128xf32, #tpu.memory_space<vmem>>, vector<1x8x128xf32>
      tpu.vector_store %arg9[%c0, %c0_3, %c0_4], %10 {strides = array<i32>} : memref<1x8x128xf32, #tpu.memory_space<vmem>>, vector<1x8x128xf32>,
    } else {
    }
    %5 = arith.index_cast %1 : i32 to index
    %6 = memref.load %arg6[%5] : memref<2xi32, #tpu.memory_space<smem>>
    %c0_i32_1 = arith.constant 0 : i32
    %7 = arith.cmpi sge, %6, %c0_i32_1 : i32
    %8 = arith.extui %7 : i1 to i32
    %c0_i32_2 = arith.constant 0 : i32
    %9 = arith.cmpi ne, %8, %c0_i32_2 : i32
    scf.if %9 {
      %10 = arith.index_cast %1 : i32 to index
      %11 = memref.load %arg2[%10] : memref<2xi32, #tpu.memory_space<smem>>
      %12 = arith.index_cast %1 : i32 to index
      %13 = memref.load %arg3[%12] : memref<2xi32, #tpu.memory_space<smem>>
      %14 = arith.index_cast %1 : i32 to index
      %15 = memref.load %arg4[%14] : memref<2xi32, #tpu.memory_space<smem>>
      %16 = arith.subi %13, %11 : i32
      %c0 = arith.constant 0 : index
      %c0_3 = arith.constant 0 : index
      %17 = vector.load %arg7[%c0, %c0_3] : memref<128x128xbf16, #tpu.memory_space<vmem>>, vector<128x128xbf16>
      %c0_4 = arith.constant 0 : index
      %c0_5 = arith.constant 0 : index
      %18 = vector.load %arg8[%c0_4, %c0_5] : memref<128x128xbf16, #tpu.memory_space<vmem>>, vector<128x128xbf16>
      %cst = arith.constant dense<0.000000e+00> : vector<128x128xf32>
      %19 = tpu.matmul %17, %18, %cst {dimension_numbers = #tpu.dot_dimension_numbers<[1], [1], [0], [0], [0, 0, 1, 0], [], []>} : vector<128x128xbf16>, vector<128x128xbf16>, vector<128x128xf32> -> vector<128x128xf32>
      %c0_i32_6 = arith.constant 0 : i32
      %20 = arith.cmpi eq, %15, %c0_i32_6 : i32
      %21 = arith.index_cast %16 : i32 to index
      %c0_7 = arith.constant 0 : index
      %c0_8 = arith.constant 0 : index
      %22 = vector.load %arg10[%21, %c0_7, %c0_8] : memref<1x128x128xf32, #tpu.memory_space<vmem>>, vector<1x128x128xf32>
      %23 = vector.shape_cast %22 : vector<1x128x128xf32> to vector<128x128xf32>
      %24 = arith.addf %23, %19 : vector<128x128xf32>
      %25 = arith.select %20, %19, %24 : vector<128x128xf32>
      %26 = arith.index_cast %16 : i32 to index
      %c0_9 = arith.constant 0 : index
      %c0_10 = arith.constant 0 : index
      %27 = vector.load %arg10[%26, %c0_9, %c0_10] : memref<1x128x128xf32, #tpu.memory_space<vmem>>, vector<1x128x128xf32>
      %28 = vector.shape_cast %27 : vector<1x128x128xf32> to vector<128x128xf32>
      %29 = vector.shape_cast %25 : vector<128x128xf32> to vector<1x128x128xf32>
      tpu.vector_store %arg10[%26, %c0_9, %c0_10], %29 {strides = array<i32>} : memref<1x128x128xf32, #tpu.memory_space<vmem>>, vector<1x128x128xf32>,
      %30 = arith.index_cast %1 : i32 to index
      %31 = memref.load %arg5[%30] : memref<2xi32, #tpu.memory_space<smem>>
      %c1_i32_11 = arith.constant 1 : i32
      %32 = arith.cmpi eq, %31, %c1_i32_11 : i32
      %33 = arith.extui %32 : i1 to i32
      %c0_i32_12 = arith.constant 0 : i32
      %34 = arith.cmpi ne, %33, %c0_i32_12 : i32
      scf.if %34 {
        %35 = arith.mulf %25, %25 : vector<128x128xf32>
        %36 = vector.shape_cast %35 : vector<128x128xf32> to vector<1x128x128xf32>
        %cst_13 = arith.constant dense<0.000000e+00> : vector<1xf32>
        %37 = vector.multi_reduction <add>, %36, %cst_13 [1, 2] : vector<1x128x128xf32> to vector<1xf32>
        %38 = vector.shape_cast %37 : vector<1xf32> to vector<1x1x1xf32>
        %39 = vector.extract %38[0, 0, 0] : f32 from vector<1x1x1xf32>
        %40 = tpu.iota {dimensions = array<i32: 0>} : vector<128x128xi32>
        %41 = tpu.iota {dimensions = array<i32: 1>} : vector<128x128xi32>
        %42 = arith.cmpi eq, %40, %41 : vector<128x128xi32>
        %cst_14 = arith.constant 0.000000e+00 : f32
        %43 = vector.broadcast %cst_14 : f32 to vector<128x128xf32>
        %44 = arith.select %42, %25, %43 : vector<128x128xi1>, vector<128x128xf32>
        %45 = vector.shape_cast %44 : vector<128x128xf32> to vector<1x128x128xf32>
        %cst_15 = arith.constant dense<0.000000e+00> : vector<1xf32>
        %46 = vector.multi_reduction <add>, %45, %cst_15 [1, 2] : vector<1x128x128xf32> to vector<1xf32>
        %47 = vector.shape_cast %46 : vector<1xf32> to vector<1x1x1xf32>
        %48 = vector.extract %47[0, 0, 0] : f32 from vector<1x1x1xf32>
        %49 = arith.cmpi eq, %11, %13 : i32
        %cst_16 = arith.constant 2.000000e+00 : f32
        %50 = arith.mulf %cst_16, %48 : f32
        %51 = arith.subf %39, %50 : f32
        %cst_17 = arith.constant 2.000000e+00 : f32
        %52 = arith.mulf %cst_17, %39 : f32
        %53 = arith.select %49, %51, %52 : f32
        %54 = tpu.iota {dimensions = array<i32: 1>} : vector<1x8x128xi32>
        %55 = tpu.iota {dimensions = array<i32: 2>} : vector<1x8x128xi32>
        %56 = vector.broadcast %6 : i32 to vector<1x8x128xi32>
        %57 = arith.cmpi eq, %54, %56 : vector<1x8x128xi32>
        %c0_i32_18 = arith.constant 0 : i32
        %58 = vector.broadcast %c0_i32_18 : i32 to vector<1x8x128xi32>
        %59 = arith.cmpi eq, %55, %58 : vector<1x8x128xi32>
        %60 = arith.andi %57, %59 : vector<1x8x128xi1>
        %c0_19 = arith.constant 0 : index
        %c0_20 = arith.constant 0 : index
        %c0_21 = arith.constant 0 : index
        %61 = vector.load %arg9[%c0_19, %c0_20, %c0_21] : memref<1x8x128xf32, #tpu.memory_space<vmem>>, vector<1x8x128xf32>
        %cst_22 = arith.constant 0.000000e+00 : f32
        %62 = vector.broadcast %53 : f32 to vector<1x8x128xf32>
        %63 = vector.broadcast %cst_22 : f32 to vector<1x8x128xf32>
        %64 = arith.select %60, %62, %63 : vector<1x8x128xi1>, vector<1x8x128xf32>
        %65 = arith.addf %61, %64 : vector<1x8x128xf32>
        %c0_23 = arith.constant 0 : index
        %c0_24 = arith.constant 0 : index
        %c0_25 = arith.constant 0 : index
        %66 = vector.load %arg9[%c0_23, %c0_24, %c0_25] : memref<1x8x128xf32, #tpu.memory_space<vmem>>, vector<1x8x128xf32>
        tpu.vector_store %arg9[%c0_23, %c0_24, %c0_25], %65 {strides = array<i32>} : memref<1x8x128xf32, #tpu.memory_space<vmem>>, vector<1x8x128xf32>,
      } else {
      }
    } else {
    }
    return
  }
  func.func @transform_0(%arg0: i32, %arg1: i32, %arg2: memref<2xi32, #tpu.memory_space<smem>>, %arg3: memref<2xi32, #tpu.memory_space<smem>>, %arg4: memref<2xi32, #tpu.memory_space<smem>>, %arg5: memref<2xi32, #tpu.memory_space<smem>>, %arg6: memref<2xi32, #tpu.memory_space<smem>>) -> (i32, i32) {
    %c1_i32 = arith.constant 1 : i32
    %0 = arith.muli %arg0, %c1_i32 : i32
    %1 = arith.addi %0, %arg1 : i32
    %2 = arith.index_cast %1 : i32 to index
    %3 = memref.load %arg2[%2] : memref<2xi32, #tpu.memory_space<smem>>
    %c1_i32_0 = arith.constant 1 : i32
    %4 = arith.muli %arg0, %c1_i32_0 : i32
    %5 = arith.addi %4, %arg1 : i32
    %6 = arith.index_cast %5 : i32 to index
    %7 = memref.load %arg4[%6] : memref<2xi32, #tpu.memory_space<smem>>
    %c0_i32 = arith.constant 0 : i32
    return %3, %7 : i32, i32
  }
  func.func @transform_1(%arg0: i32, %arg1: i32, %arg2: memref<2xi32, #tpu.memory_space<smem>>, %arg3: memref<2xi32, #tpu.memory_space<smem>>, %arg4: memref<2xi32, #tpu.memory_space<smem>>, %arg5: memref<2xi32, #tpu.memory_space<smem>>, %arg6: memref<2xi32, #tpu.memory_space<smem>>) -> (i32, i32) {
    %c1_i32 = arith.constant 1 : i32
    %0 = arith.muli %arg0, %c1_i32 : i32
    %1 = arith.addi %0, %arg1 : i32
    %2 = arith.index_cast %1 : i32 to index
    %3 = memref.load %arg3[%2] : memref<2xi32, #tpu.memory_space<smem>>
    %c1_i32_0 = arith.constant 1 : i32
    %4 = arith.muli %arg0, %c1_i32_0 : i32
    %5 = arith.addi %4, %arg1 : i32
    %6 = arith.index_cast %5 : i32 to index
    %7 = memref.load %arg4[%6] : memref<2xi32, #tpu.memory_space<smem>>
    %c0_i32 = arith.constant 0 : i32
    return %3, %7 : i32, i32
  }
  func.func @transform_2(%arg0: i32, %arg1: i32, %arg2: memref<2xi32, #tpu.memory_space<smem>>, %arg3: memref<2xi32, #tpu.memory_space<smem>>, %arg4: memref<2xi32, #tpu.memory_space<smem>>, %arg5: memref<2xi32, #tpu.memory_space<smem>>, %arg6: memref<2xi32, #tpu.memory_space<smem>>) -> (i32, i32, i32) {
    %c0_i32 = arith.constant 0 : i32
    %c0_i32_0 = arith.constant 0 : i32
    %c0_i32_1 = arith.constant 0 : i32
    return %arg0, %c0_i32, %c0_i32_0 : i32, i32, i32
  }
}

</mosaic_0001>

<bundles_post_ra>
// kernel: tpu_custom_call.1
= control target key start
LH: loop header
LB: loop body
LE: loop exit
PB: predicated region body
PF: predicated region fallthrough
CT: control target
= control target key end

     0   :  { %s1345_s24 = smov [#allocation4]   ;;  %s1985_s0 = inlined_call_operand.hbm [shape: s32[2], index: 0, kind: input, shape index: {}]   ;;  %s1986_s5 = inlined_call_operand.hbm [shape: bf16[128,128], index: 5, kind: input, shape index: {}]   ;;  %s1987_s6 = inlined_call_operand.hbm [shape: bf16[128,128], index: 6, kind: input, shape index: {}]   ;;  %s1988_s7 = inlined_call_operand.hbm [shape: f32[2,8,128], index: 7, kind: output, shape index: {}]   ;;  %s1989_s1 = inlined_call_operand.vmem [shape: s32[2], index: 1, kind: input, shape index: {}]   ;;  %s1990_s2 = inlined_call_operand.vmem [shape: s32[2], index: 2, kind: input, shape index: {}]   ;;  %s1991_s3 = inlined_call_operand.vmem [shape: s32[2], index: 3, kind: input, shape index: {}]   ;;  %s1992_s4 = inlined_call_operand.vmem [shape: s32[2], index: 4, kind: input, shape index: {}]  }
   0x1   :  { %2006 = sst [smem:[#allocation33_spill]] %s1986_s5  ;;  %s14_s29 = sshll.u32 %s1989_s1, 4  ;;  %s15_s29 = int_to_ptr.vmem [resolvable:$true] %s14_s29 }
   0x2   :  { %2007 = sst [smem:[#allocation34_spill]] %s1988_s7  ;;  %s18_s9 = sshll.u32 %s1990_s2, 4  ;;  %s19_s9 = int_to_ptr.vmem [resolvable:$true] %s18_s9 }
   0x3   :  { %13 = dma.hbm_to_smem %s1985_s0, 16, %s1345_s24, [#allocation3] }
   0x4   :  { %s1105_s10 = scalar_lea.vmem %s15_s29, 16  ;;  %p1110_p1 = scmp.lt.s32.totalorder %s15_s29, %s15_s29 }
   0x5   :  { %p1106_p0 = scmp.ne.s32.totalorder %s15_s29, %s1105_s10  ;;  %p1111_p2 = scmp.lt.s32.totalorder %s1105_s10, %s1105_s10 }
   0x7   :  { %p1112_p3 = por %p1111_p2, %p1110_p1 }
   0x9   :  { %p1113_p4 = pnand %p1112_p3, %p1106_p0 }
   0xb   :  { %1116 = shalt.err (!%p1113_p4)  }
   0xc   :  { %s1346_s11 = smov [#allocation5]   ;;  %s22_s13 = sshll.u32 %s1991_s3, 4  ;;  %s23_s13 = int_to_ptr.vmem [resolvable:$true] %s22_s13 }
   0xd   :  { %17 = dma.vmem_to_smem %s15_s29, 16, %s1346_s11, [#allocation3] }
   0xe   :  { %s1117_s1 = scalar_lea.vmem %s19_s9, 16  ;;  %p1122_p6 = scmp.lt.s32.totalorder %s19_s9, %s19_s9 }
   0xf   :  { %p1118_p5 = scmp.ne.s32.totalorder %s19_s9, %s1117_s1  ;;  %p1123_p7 = scmp.lt.s32.totalorder %s1117_s1, %s1117_s1 }
  0x11   :  { %p1124_p8 = por %p1123_p7, %p1122_p6 }
  0x13   :  { %p1125_p9 = pnand %p1124_p8, %p1118_p5 }
  0x15   :  { %1128 = shalt.err (!%p1125_p9)  }
  0x16   :  { %s1347_s2 = smov [#allocation6]   ;;  %s1129_s14 = scalar_lea.vmem %s23_s13, 16 }
  0x17   :  { %21 = dma.vmem_to_smem %s19_s9, 16, %s1347_s2, [#allocation3] }
  0x18   :  { %p1130_p10 = scmp.ne.s32.totalorder %s23_s13, %s1129_s14  ;;  %p1134_p11 = scmp.lt.s32.totalorder %s23_s13, %s23_s13 }
  0x19   :  { %p1135_p12 = scmp.lt.s32.totalorder %s1129_s14, %s1129_s14 }
  0x1b   :  { %p1136_p13 = por %p1135_p12, %p1134_p11 }
  0x1d   :  { %p1137_p0 = pnand %p1136_p13, %p1130_p10 }
  0x1f   :  { %1140 = shalt.err (!%p1137_p0)  }
  0x20   :  { %s1348_s15 = smov [#allocation7]   ;;  %s26_s17 = sshll.u32 %s1992_s4, 4  ;;  %s27_s17 = int_to_ptr.vmem [resolvable:$true] %s26_s17 }
  0x21   :  { %25 = dma.vmem_to_smem %s23_s13, 16, %s1348_s15, [#allocation3] }
  0x22   :  { %s1141_s18 = scalar_lea.vmem %s27_s17, 16  ;;  %p1146_p2 = scmp.lt.s32.totalorder %s27_s17, %s27_s17 }
  0x23   :  { %p1142_p1 = scmp.ne.s32.totalorder %s27_s17, %s1141_s18  ;;  %p1147_p3 = scmp.lt.s32.totalorder %s1141_s18, %s1141_s18 }
  0x25   :  { %p1148_p4 = por %p1147_p3, %p1146_p2 }
  0x27   :  { %p1149_p5 = pnand %p1148_p4, %p1142_p1 }
  0x29   :  { %1152 = shalt.err (!%p1149_p5)  }
  0x2a   :  { %s1349_s19 = smov [#allocation8]  }
  0x2b   :  { %29 = dma.vmem_to_smem %s27_s17, 16, %s1349_s19, [#allocation3] }
  0x2c   :  { %1283 = dma.done.wait [#allocation3], 80 }
  0x2d   :  { %1284 = vsyncadd [#allocation3], 4294967216 }
  0x2e   :  { %31 = sfence }
  0x2f   :  { %32 = vsyncpa [#allocation10], 0 }
  0x30   :  { %34 = vsyncpa [#allocation10 + $0x1], 0 }
  0x31   :  { %35 = vsyncpa [#allocation13], 0 }
  0x32   :  { %37 = vsyncpa [#allocation13 + $0x1], 0 }
  0x33   :  { %38 = vsyncpa [#allocation11], 0 }
  0x34   :  { %40 = vsyncpa [#allocation11 + $0x1], 0  ;;  %s1411_s4 = smov 0   ;;  %s1413_s20 = smov 0  }
  0x35   :  { %s1415_s21 = smov 0   ;;  %s1417_s22 = smov 0  }
  0x36   :  { %s1419_s23 = smov 0   ;;  %s1421_s24 = smov 0  }
  0x37   :  { %s1423_s25 = smov 0   ;;  %s1425_s26 = smov 0  }
  0x38   :  { %s1427_s27 = smov 0   ;;  %s1429_s28 = smov 0  }
  0x39   :  { %s1431_s29 = smov 0   ;;  %s1433_s30 = smov 0  }
  0x3a LB: > { %2008 = sst [smem:[#allocation27_spill]] %s1299_s4  ;;  %s837_s8 = sadd.s32 4294967295, %s1343_s30   ;;  %s1343_s30 = sphi %s1433_s30, %s46_s30   ;;  %s1339_s29 = sphi %s1431_s29, %s2056_s29   ;;  %s1335_s28 = sphi %s1429_s28, %s2055_s28   ;;  %s1331_s27 = sphi %s1427_s27, %s2047_s27   ;;  %s1327_s26 = sphi %s1425_s26, %s2054_s26   ;;  %s1323_s25 = sphi %s1423_s25, %s2053_s25   ;;  %s1319_s24 = sphi %s1421_s24, %s2052_s24   ;;  %s1315_s23 = sphi %s1419_s23, %s2051_s23   ;;  %s1311_s22 = sphi %s1417_s22, %s2050_s22   ;;  %s1307_s21 = sphi %s1415_s21, %s2045_s21   ;;  %s1303_s20 = sphi %s1413_s20, %s2049_s20   ;;  %s1299_s4 = sphi %s1411_s4, %s2048_s4  }
  0x3b   : > { %2009 = sst [smem:[#allocation28_spill]] %s1307_s21  ;;  %s838_s9 = sadd.s32 4294967294, %s1343_s30  }
  0x3c   : > { %2010 = sst [smem:[#allocation29_spill]] %s1331_s27  ;;  %s58_s10 = sadd.s32 1, %s1339_s29 }
  0x3d   : > { %s63_s11 = sld [smem:[#allocation4 + %s1339_s29]]  ;;  %p60_p6 = scmp.ge.s32.totalorder %s58_s10, 2 }
  0x3e   : > { %s64_s0 = sld [smem:[#allocation6 + %s1339_s29]]  ;;  %s73_s12 = sadd.s32 1, %s1331_s27 }
  0x3f   : > { %p80_p7 = scmp.ne.s32.totalorder %s1331_s27, %s1327_s26  ;;  %s2058_s10 = smov (%p60_p6, %s58_s10), 0 }
  0x40   : > { %p1998_p8 = scmp.eq.s32.totalorder %s1343_s30, 0  ;;  %p86_p9 = scmp.ne.s32.totalorder %s1327_s26, %s1323_s25 }
  0x41   : > { %s66_s13 = sld [smem:[#allocation4 + %s2058_s10]]  ;;  %p1482_p10 = scmp.eq.s32.totalorder %s837_s8, 0 }
  0x42   : > { %s67_s2 = sld [smem:[#allocation6 + %s2058_s10]]  ;;  %p1489_p11 = por %p1998_p8, %p80_p7 }
  0x43   : > { %s2011_s1 = scalar_select %p1482_p10, 1, 0 }
  0x44   : > { %p1495_p12 = por %p1482_p10, %p86_p9  ;;  %s130_s3 = ssub.s32 %s1339_s29, %s2058_s10 }
  0x45   : > { %p131_p13 = scmp.eq.s32.totalorder %s130_s3, 0  ;;  %s133_s16 = sadd.s32 1, %s1307_s21 }
  0x46   : > { %s2013_s15 = scalar_select %p1495_p12, 1, 0 }
  0x47   : > { %p143_p0 = scmp.ne.s32.totalorder %s1307_s21, %s1303_s20  ;;  %p144_p1 = scmp.eq.s32.totalorder %s837_s8, 1 }
  0x48   : > { %s1505_s17 = scalar_select %p131_p13, %s1307_s21, %s133_s16  }
  0x49   : > { %s68_s18 = ssub.s32 %s63_s11, %s66_s13  ;;  %p1507_p2 = por %p144_p1, %p143_p0 }
  0x4a   : > { %2014 = sst [smem:[#allocation30_spill]] %s1505_s17  ;;  %s69_s25 = ssub.s32 %s64_s0, %s67_s2 }
  0x4b   : > { %s2015_s19 = scalar_select %p1507_p2, 1, 0 }
  0x4c   : > { %p149_p3 = scmp.ne.s32.totalorder %s1303_s20, %s1299_s4  ;;  %s70_s3 = sor.u32 %s69_s25, %s68_s18 }
  0x4d   : > { %p150_p4 = scmp.eq.s32.totalorder %s838_s9, 1  ;;  %p71_p5 = scmp.eq.s32.totalorder %s70_s3, 0 }
  0x4e   : > { %p1997_p9 = scmp.lt.s32.totalorder %s1343_s30, 2  ;;  %s170_s13 = sand.u32 1, %s1331_s27  }
  0x4f   : > { %p1514_p7 = por %p150_p4, %p149_p3  ;;  %s841_s9 = sshll.u32 %s170_s13, 6 }
  0x50   : > { %s1520_s11 = scalar_select %p71_p5, %s1331_s27, %s73_s12  }
  0x51   : > { %s2016_s8 = scalar_select %p1514_p7, 1, 0 }
  0x52   : > { %2018 = sst [smem:[#allocation32_spill]] %s1520_s11  ;;  %p1527_p13 = pnand %p1997_p9, %p1489_p11 }
  0x53   : > { %2017 = sst [smem:[#allocation31_spill]] %s2016_s8  ;;  %s174_s25 = scalar_lea.vmem [#allocation9], %s841_s9 }
  0x54   : > { %s942_s2 = scalar_select %p1489_p11, [#allocation4], [#allocation15] }
  0x55   : > { %s943_s16 = scalar_select %p1489_p11, %s1339_s29, 0 }
  0x56   : > { %s2060_s2 = smov (!%p1997_p9, %s942_s2), [#allocation19]  ;;  %s185_s3 = sshll.u32 %s174_s25, 4  ;;  %s1544_s3 = int_to_ptr.vmem [resolvable:$true] %s185_s3 }
  0x57   : > { %s2062_s16 = smov (!%p1997_p9, %s943_s16), 0  ;;  %p847_p0 = scmp.ge.s32.totalorder %s1343_s30, 1 }
  0x58   : > { %s944_s12 = scalar_select %p1489_p11, [#allocation6], [#allocation16] }
  0x59   : > { %s176_s18 = sld [smem:[%s2060_s2 + %s2062_s16]]  ;;  %p218_p1 = scmp.lt.s32.totalorder %s1343_s30, 3 }
  0x5a   : > { %s2064_s12 = smov (!%p1997_p9, %s944_s12), [#allocation20]  ;;  %s1553_s14 = sld [smem:[#allocation5 + %s1339_s29]] }
  0x5b   : > { %s177_s11 = sld [smem:[%s2064_s12 + %s2062_s16]]  ;;  %p1548_p3 = pnand %p847_p0, %p218_p1 }
  0x5c   : > { %s1556_s2 = sld [smem:[#allocation6 + %s1339_s29]]  ;;  %s1566_s12 = scalar_lea.sflag [#allocation10], %s170_s13 }
  0x5d   : > { %s2020_s17 = scalar_select %p1548_p3, 1, 0 }
  0x5e   : > { %s2021_s5 = sld [smem:[#allocation33_spill]]  ;;  %p1155_p4 = pneg %p1527_p13 }
  0x5f   : > { %s842_s27 = sshll.u32 %s176_s18, 4  ;;  %s1564_s16 = sld [smem:[#allocation5 + %s2058_s10]] }
  0x61   : > { %s182_s21 = sadd.s32 %s842_s27, %s177_s11 }
  0x62   : > { %s843_s8 = sshll.u32 %s182_s21, 6 }
  0x64   : > { %s1561_s4 = scalar_lea.hbm %s2021_s5, %s843_s8  ;;  %s1158_s11 = scalar_lea.hbm %s2021_s5, 1024 }
  0x65   : > { %s1153_s18 = scalar_lea.hbm %s1561_s4, 1024  ;;  %p1159_p1 = scmp.lt.s32.totalorder %s1561_s4, %s2021_s5 }
  0x66   : > { %p1154_p11 = scmp.ne.s32.totalorder %s1561_s4, %s1153_s18  ;;  %p1160_p6 = scmp.lt.s32.totalorder %s1158_s11, %s1153_s18 }
  0x68   : > { %p1156_p5 = pnand %p1155_p4, %p1154_p11  ;;  %p1161_p9 = por %p1160_p6, %p1159_p1 }
  0x6a   : > { %p1157_p0 = pneg %p1156_p5 }
  0x6c   : > { %p1162_p8 = pnand %p1161_p9, %p1157_p0 }
  0x6e   : > { %1165 = shalt.err (!%p1162_p8)
}
  0x6f   : > { %s1166_s13 = scalar_lea.vmem %s1544_s3, 1024  ;;  %s1350_s25 = smov [#allocation9]  }
  0x70   : > { %p1167_p7 = scmp.ne.s32.totalorder %s1544_s3, %s1166_s13  ;;  %s1171_s7 = sshll.u32 %s1350_s25, 4  ;;  %s1172_s7 = int_to_ptr.vmem [resolvable:$false] %s1171_s7 }
  0x71   : > { %s1173_s21 = scalar_lea.vmem %s1172_s7, 2048  ;;  %p1174_p5 = scmp.lt.s32.totalorder %s1544_s3, %s1172_s7 }
  0x72   : > { %p1169_p2 = pnand %p1167_p7, %p1155_p4  ;;  %p1175_p12 = scmp.lt.s32.totalorder %s1173_s21, %s1166_s13 }
  0x74   : > { %p1170_p11 = pneg %p1169_p2  ;;  %p1176_p3 = por %p1175_p12, %p1174_p5 }
  0x76   : > { %p1177_p10 = pnand %p1176_p3, %p1170_p11 }
  0x78   : > { %1180 = shalt.err (!%p1177_p10)
}
  0x79   : > { %s2003_s18 = smov 64   ;;  %s2004_s7 = smov 4  }
  0x7a   : > { %963 = dma.hbm_to_vmem [thread:$0]  (!%p1527_p13), %s1561_s4, 1024, %s1544_s3, %s1566_s12, %s2003_s18, %s2003_s18, %s2004_s7  }
  0x7b   : > { %s101_s27 = sld [smem:[#allocation6 + %s2058_s10]]  ;;  %p114_p8 = scmp.ne.s32.totalorder %s1319_s24, %s1315_s23 }
  0x7c   : > { %p120_p10 = scmp.ne.s32.totalorder %s1315_s23, %s1311_s22  ;;  %p2022_p12 = scmp.ne.s32.totalorder %s2011_s1, 0 }
  0x7d   : > { %s102_s9 = ssub.s32 %s1553_s14, %s1564_s16  ;;  %s195_s8 = sand.u32 1, %s1319_s24  }
  0x7e   : > { %p1597_p2 = por %p120_p10, %p2022_p12  ;;  %p2024_p6 = scmp.eq.s32.totalorder %s1343_s30, 0 }
  0x7f   : > { %s107_s3 = sadd.s32 1, %s1319_s24  ;;  %s844_s1 = sshll.u32 %s195_s8, 6 }
  0x80   : > { %s2023_s11 = scalar_select %p1597_p2, 1, 0 }
  0x81   : > { %p1606_p7 = por %p114_p8, %p2024_p6  ;;  %s103_s4 = ssub.s32 %s1556_s2, %s101_s27 }
  0x82   : > { %s104_s22 = sor.u32 %s103_s4, %s102_s9  ;;  %p2026_p13 = scmp.lt.s32.totalorder %s1343_s30, 2 }
  0x83   : > { %p105_p9 = scmp.eq.s32.totalorder %s104_s22, 0  ;;  %s199_s9 = scalar_lea.vmem [#allocation12], %s844_s1 }
  0x84   : > { %p1616_p3 = pnand %p2026_p13, %p1606_p7  ;;  %p2028_p4 = pmov %p2026_p13 }
  0x85   : > { %s947_s16 = scalar_select %p1606_p7, [#allocation5], [#allocation17] }
  0x86   : > { %s1623_s12 = scalar_select %p105_p9, %s1319_s24, %s107_s3  }
  0x87   : > { %s948_s13 = scalar_select %p1606_p7, %s1339_s29, 0 }
  0x88   : > { %s2066_s16 = smov (!%p2028_p4, %s947_s16), [#allocation21]  ;;  %p2029_p0 = pmov %p2028_p4 }
  0x89   : > { %s949_s2 = scalar_select %p1606_p7, [#allocation6], [#allocation18] }
  0x8a   : > { %s2068_s13 = smov (!%p2029_p0, %s948_s13), 0  ;;  %p2030_p1 = pmov %p2029_p0 }
  0x8b   : > { %s201_s25 = sld [smem:[%s2066_s16 + %s2068_s13]]  ;;  %s210_s4 = sshll.u32 %s199_s9, 4  ;;  %s1636_s4 = int_to_ptr.vmem [resolvable:$true] %s210_s4 }
  0x8c   : > { %s2070_s2 = smov (!%p2030_p1, %s949_s2), [#allocation22]  ;;  %s1643_s0 = scalar_lea.sflag [#allocation13], %s195_s8 }
  0x8d   : > { %s202_s21 = sld [smem:[%s2070_s2 + %s2068_s13]]  ;;  %p1183_p5 = pneg %p1616_p3 }
  0x8e   : > { %s1186_s2 = scalar_lea.hbm %s1987_s6, 1024 }
  0x91   : > { %s845_s27 = sshll.u32 %s201_s25, 4 }
  0x93   : > { %s207_s22 = sadd.s32 %s845_s27, %s202_s21 }
  0x94   : > { %s846_s3 = sshll.u32 %s207_s22, 6 }
  0x95   : > { %s1641_s5 = scalar_lea.hbm %s1987_s6, %s846_s3 }
  0x96   : > { %s1181_s16 = scalar_lea.hbm %s1641_s5, 1024  ;;  %p1187_p12 = scmp.lt.s32.totalorder %s1641_s5, %s1987_s6 }
  0x97   : > { %p1182_p11 = scmp.ne.s32.totalorder %s1641_s5, %s1181_s16  ;;  %p1188_p6 = scmp.lt.s32.totalorder %s1186_s2, %s1181_s16 }
  0x99   : > { %p1184_p8 = pnand %p1183_p5, %p1182_p11  ;;  %p1189_p7 = por %p1188_p6, %p1187_p12 }
  0x9b   : > { %p1185_p10 = pneg %p1184_p8 }
  0x9d   : > { %p1190_p9 = pnand %p1189_p7, %p1185_p10 }
  0x9f   : > { %1193 = shalt.err (!%p1190_p9)
}
  0xa0   : > { %s1194_s18 = scalar_lea.vmem %s1636_s4, 1024  ;;  %s1353_s7 = smov [#allocation12]  }
  0xa1   : > { %p1195_p13 = scmp.ne.s32.totalorder %s1636_s4, %s1194_s18  ;;  %s1199_s8 = sshll.u32 %s1353_s7, 4  ;;  %s1200_s8 = int_to_ptr.vmem [resolvable:$false] %s1199_s8 }
  0xa2   : > { %s1201_s27 = scalar_lea.vmem %s1200_s8, 2048  ;;  %p1202_p1 = scmp.lt.s32.totalorder %s1636_s4, %s1200_s8 }
  0xa3   : > { %p1197_p4 = pnand %p1195_p13, %p1183_p5  ;;  %p1203_p11 = scmp.lt.s32.totalorder %s1201_s27, %s1194_s18 }
  0xa5   : > { %p1198_p0 = pneg %p1197_p4  ;;  %p1204_p8 = por %p1203_p11, %p1202_p1 }
  0xa7   : > { %p1205_p2 = pnand %p1204_p8, %p1198_p0 }
  0xa9   : > { %1208 = shalt.err (!%p1205_p2)
}
  0xaa   : > { %s2031_s9 = smov 4   ;;  %s2032_s22 = smov 64  }
  0xab   : > { %970 = dma.hbm_to_vmem [thread:$0]  (!%p1616_p3), %s1641_s5, 1024, %s1636_s4, %s1643_s0, %s2032_s22, %s2032_s22, %s2031_s9  }
  0xac   : > { %p2033_p5 = scmp.ne.s32.totalorder %s2020_s17, 0 }
  0xad   : > { %s224_s3 = sand.u32 (!%p2033_p5), 1, %s1327_s26   ;;  %p2034_p2 = scmp.ne.s32.totalorder (!%p2033_p5), %s2013_s15, 0 }
  0xae   : > { %222 = sbr.rel (%p2033_p5) target bundleno = 747 (0x2eb), region = 28  ;;  %s848_s16 = sshll.u32 (!%p2033_p5), %s224_s3, 6 }
  0xaf   : > { %s225_s1 = scalar_lea.sflag (!%p2033_p5), [#allocation10], %s224_s3  ;;  %s1670_s13 = scalar_lea.vmem (!%p2033_p5), [#allocation9], %s848_s16 }
  0xb3   : > { %1286 = dma.done.wait (%p2034_p2), %s225_s1, 1024  }
  0xb4   : > { %1288 = vsyncadd (%p2034_p2), %s225_s1, 4294966272  ;;  %s233_s14 = sand.u32 1, %s1315_s23   ;;  %p2035_p3 = scmp.ne.s32.totalorder %s2023_s11, 0 }
  0xb5   : > { %s849_s2 = sshll.u32 %s233_s14, 6  ;;  %s234_s5 = scalar_lea.sflag [#allocation13], %s233_s14 }
  0xb6   : > { %s1677_s4 = scalar_lea.vmem [#allocation12], %s849_s2 }
  0xb7   : > { %1290 = dma.done.wait (%p2035_p3), %s234_s5, 1024  }
  0xb8   : > { %1292 = vsyncadd (%p2035_p3), %s234_s5, 4294966272  ;;  %s260_s17 = sand.u32 1, %s1303_s20   ;;  %s1685_s0 = sld [smem:[#allocation8 + %s1335_s28]]  ;;  %v1354_v0 = vmov 0.0  }
  0xb9   : > { %s850_s15 = sshll.u32 %s260_s17, 3 }
  0xba   : > { %s1689_s25 = scalar_lea.vmem [#allocation14], %s850_s15 }
  0xbb   : > { %277 = vst [vmem:[%s1689_s25] sm:$0xff] %v1354_v0 }
  0xbe   : > { %p851_p10 = scmp.lt.s32.totalorder %s1685_s0, 0 }
  0xbf   : > { %s1710_s11 = sld [smem:[#allocation7 + %s1335_s28]] (!%p851_p10) }
  0xc0   : > { %282 = sbr.rel (%p851_p10) target bundleno = 722 (0x2d2), region = 44  ;;  %s1713_s21 = sld [smem:[#allocation4 + %s1335_s28]] (!%p851_p10) }
  0xc1   : > { %s1716_s18 = sld [smem:[#allocation5 + %s1335_s28]] (!%p851_p10) }
  0xc2   : > { %s285_s7 = sld [smem:[#allocation6 + %s1335_s28]] (!%p851_p10) }
  0xc5   : > { %v1081_v1 = vld [vmem:[%s1677_s4 + $0x38] sm:$0xff]   ;;  %v1082_v2 = vld [vmem:[%s1677_s4 + $0x30] sm:$0xff]   ;;  %v1083_v3 = vld [vmem:[%s1677_s4 + $0x28] sm:$0xff]   ;;  %p869_p6 = scmp.ne.s32.totalorder %s1710_s11, 1 }
  0xc6   : > { %890 = vmatprep.subr.bf16.mxu0 %v1081_v1  ;;  %922 = vmatprep.subr.bf16.mxu1 %v1081_v1  ;;  %v1089_v4 = vld [vmem:[%s1670_s13] sm:$0xff]   ;;  %v1085_v7 = vld [vmem:[%s1677_s4 + $0x18] sm:$0xff]   ;;  %v1086_v8 = vld [vmem:[%s1677_s4 + $0x10] sm:$0xff]  }
  0xc7   : > { %891 = vmatpush3.bf16.xpose.msra.mxu0 %v1081_v1  ;;  %930 = vmatpush3.bf16.xpose.msra.mxu1 %v1081_v1  ;;  %v1090_v5 = vld [vmem:[%s1670_s13 + $0x20] sm:$0xff]   ;;  %v1087_v9 = vld [vmem:[%s1677_s4 + $0x8] sm:$0xff]   ;;  %v1093_v13 = vld [vmem:[%s1670_s13 + $0x10] sm:$0xff]   ;;  %s286_s8 = ssub.s32 %s1716_s18, %s1713_s21  ;;  %p702_p7 = scmp.eq.s32.totalorder (!%p869_p6), %s1713_s21, %s1716_s18 }
  0xc8   : > { %892 = vmatprep.subr.bf16.mxu0 %v1082_v2  ;;  %923 = vmatprep.subr.bf16.mxu1 %v1082_v2  ;;  %v1084_v6 = vld [vmem:[%s1677_s4 + $0x20] sm:$0xff]   ;;  %v1091_v11 = vld [vmem:[%s1670_s13 + $0x8] sm:$0xff]   ;;  %v1094_v14 = vld [vmem:[%s1670_s13 + $0x30] sm:$0xff]   ;;  %p512_p12 = scmp.eq.s32.totalorder %s285_s7, 0  ;;  %s868_s27 = sshll.u32 %s286_s8, 7 }
  0xc9   : > { %906 = vmatprep.mubr.bf16.mxu0 %v1089_v4  ;;  %914 = vmatprep.mubr.bf16.mxu1 %v1090_v5  ;;  %v1088_v10 = vld [vmem:[%s1677_s4] sm:$0xff]   ;;  %v1092_v12 = vld [vmem:[%s1670_s13 + $0x28] sm:$0xff]   ;;  %v1095_v15 = vld [vmem:[%s1670_s13 + $0x18] sm:$0xff]   ;;  %s1721_s22 = scalar_lea.vmem [#allocation2], %s868_s27 }
  0xca   : > { %v1096_v16 = vld [vmem:[%s1670_s13 + $0x38] sm:$0xff]   ;;  %s547_s9 = scalar_select %p512_p12, 1, 0  ;;  %v517_v18 = vld [vmem:[%s1721_s22 + $0x10] sm:$0xff]  ;;  %v515_v23 = vld [vmem:[%s1721_s22] sm:$0xff] }
  0xcb   : > { %v525_v19 = vld [vmem:[%s1721_s22 + $0x50] sm:$0xff]  ;;  %v523_v24 = vld [vmem:[%s1721_s22 + $0x40] sm:$0xff]  ;;  %v518_v29 = vld [vmem:[%s1721_s22 + $0x18] sm:$0xff] }
  0xcc   : > { %v548_v17 = vstv %s547_s9  ;;  %v526_v30 = vld [vmem:[%s1721_s22 + $0x58] sm:$0xff]  ;;  %v516_v37 = vld [vmem:[%s1721_s22 + $0x8] sm:$0xff]  ;;  %v521_v45 = vld [vmem:[%s1721_s22 + $0x30] sm:$0xff] }
  0xcd   : > { %vm1725_vm0 = vcmp.eq.s32.totalorder %v548_v17, 1  ;;  %v524_v38 = vld [vmem:[%s1721_s22 + $0x48] sm:$0xff]  ;;  %v529_v46 = vld [vmem:[%s1721_s22 + $0x70] sm:$0xff]  ;;  %v519_v53 = vld [vmem:[%s1721_s22 + $0x20] sm:$0xff] }
  0xce   : > { %v527_v54 = vld [vmem:[%s1721_s22 + $0x60] sm:$0xff]  ;;  %v522_v61 = vld [vmem:[%s1721_s22 + $0x38] sm:$0xff]  ;;  %v520_v5 = vld [vmem:[%s1721_s22 + $0x28] sm:$0xff] }
  0xcf   : > { %893 = vmatpush3.bf16.xpose.msra.mxu0 %v1082_v2  ;;  %931 = vmatpush3.bf16.xpose.msra.mxu1 %v1082_v2  ;;  %v530_v62 = vld [vmem:[%s1721_s22 + $0x78] sm:$0xff] }
  0xd0   : > { %894 = vmatprep.subr.bf16.mxu0 %v1083_v3  ;;  %924 = vmatprep.subr.bf16.mxu1 %v1083_v3 }
  0xd7   : > { %895 = vmatpush3.bf16.xpose.msra.mxu0 %v1083_v3  ;;  %932 = vmatpush3.bf16.xpose.msra.mxu1 %v1083_v3 }
  0xd8   : > { %896 = vmatprep.subr.bf16.mxu0 %v1084_v6  ;;  %925 = vmatprep.subr.bf16.mxu1 %v1084_v6 }
  0xdf   : > { %897 = vmatpush3.bf16.xpose.msra.mxu0 %v1084_v6  ;;  %933 = vmatpush3.bf16.xpose.msra.mxu1 %v1084_v6  ;;  %v528_v6 = vld [vmem:[%s1721_s22 + $0x68] sm:$0xff] }
  0xe0   : > { %898 = vmatprep.subr.bf16.mxu0 %v1085_v7  ;;  %926 = vmatprep.subr.bf16.mxu1 %v1085_v7 }
  0xe7   : > { %899 = vmatpush3.bf16.xpose.msra.mxu0 %v1085_v7  ;;  %934 = vmatpush3.bf16.xpose.msra.mxu1 %v1085_v7 }
  0xe8   : > { %900 = vmatprep.subr.bf16.mxu0 %v1086_v8  ;;  %927 = vmatprep.subr.bf16.mxu1 %v1086_v8 }
  0xef   : > { %901 = vmatpush3.bf16.xpose.msra.mxu0 %v1086_v8  ;;  %935 = vmatpush3.bf16.xpose.msra.mxu1 %v1086_v8 }
  0xf0   : > { %902 = vmatprep.subr.bf16.mxu0 %v1087_v9  ;;  %928 = vmatprep.subr.bf16.mxu1 %v1087_v9 }
  0xf7   : > { %903 = vmatpush3.bf16.xpose.msra.mxu0 %v1087_v9  ;;  %936 = vmatpush3.bf16.xpose.msra.mxu1 %v1087_v9 }
  0xf8   : > { %904 = vmatprep.subr.bf16.mxu0 %v1088_v10  ;;  %929 = vmatprep.subr.bf16.mxu1 %v1088_v10 }
  0xff   : > { %905 = vmatpush3.bf16.xpose.msra.mxu0 %v1088_v10  ;;  %937 = vmatpush3.bf16.xpose.msra.mxu1 %v1088_v10 }
 0x106   : > { %907 = vmatmul.mubr.bf16.vlgmr.msra.gmra.mxu0 %v1091_v11  ;;  %915 = vmatmul.mubr.bf16.vlgmr.msra.gmra.mxu1 %v1092_v12 }
 0x107   : > { %910 = vmatprep.mubr.bf16.mxu0 %v1093_v13  ;;  %918 = vmatprep.mubr.bf16.mxu1 %v1094_v14 }
 0x10e   : > { %911 = vmatmul.mubr.bf16.gmra.mxu0 %v1095_v15  ;;  %919 = vmatmul.mubr.bf16.gmra.mxu1 %v1096_v16 }
 0x1c6   : > { %v908_v20 = vpop.f32.mrf.mxu0  ;;  %v916_v22 = vpop.f32.mrf.mxu1 }
 0x1c7   : > { %v533_v25 = vadd.f32 %v908_v20, %v517_v18  ;;  %v541_v26 = vadd.f32 %v916_v22, %v525_v19 }
 0x1c8   : > { %v449_v27 = vpop.f32.mrf.mxu0  ;;  %v481_v28 = vpop.f32.mrf.mxu1 }
 0x1c9   : > { %v1735_v31 = vsel %vm1725_vm0, %v908_v20, %v533_v25  ;;  %v1739_v32 = vsel %vm1725_vm0, %v916_v22, %v541_v26  ;;  %v531_v33 = vadd.f32 %v515_v23, %v449_v27  ;;  %v539_v34 = vadd.f32 %v523_v24, %v481_v28 }
 0x1ca   : > { %568 = vst [vmem:[%s1721_s22 + $0x10] sm:$0xff] %v1735_v31  ;;  %576 = vst [vmem:[%s1721_s22 + $0x50] sm:$0xff] %v1739_v32  ;;  %v909_v35 = vpop.f32.mrf.mxu0  ;;  %v917_v36 = vpop.f32.mrf.mxu1 }
 0x1cb   : > { %v1749_v39 = vsel %vm1725_vm0, %v449_v27, %v531_v33  ;;  %v1753_v40 = vsel %vm1725_vm0, %v481_v28, %v539_v34  ;;  %v534_v41 = vadd.f32 %v909_v35, %v518_v29  ;;  %v542_v42 = vadd.f32 %v917_v36, %v526_v30 }
 0x1cc   : > { %566 = vst [vmem:[%s1721_s22] sm:$0xff] %v1749_v39  ;;  %574 = vst [vmem:[%s1721_s22 + $0x40] sm:$0xff] %v1753_v40  ;;  %v452_v43 = vpop.f32.mrf.mxu0  ;;  %v484_v44 = vpop.f32.mrf.mxu1 }
 0x1cd   : > { %v1763_v47 = vsel %vm1725_vm0, %v909_v35, %v534_v41  ;;  %v1767_v48 = vsel %vm1725_vm0, %v917_v36, %v542_v42  ;;  %v532_v49 = vadd.f32 %v516_v37, %v452_v43  ;;  %v540_v50 = vadd.f32 %v524_v38, %v484_v44 }
 0x1ce   : > { %569 = vst [vmem:[%s1721_s22 + $0x18] sm:$0xff] %v1763_v47  ;;  %577 = vst [vmem:[%s1721_s22 + $0x58] sm:$0xff] %v1767_v48  ;;  %v912_v51 = vpop.f32.mrf.mxu0  ;;  %v920_v52 = vpop.f32.mrf.mxu1 }
 0x1cf   : > { %v1777_v55 = vsel %vm1725_vm0, %v452_v43, %v532_v49  ;;  %v1781_v56 = vsel %vm1725_vm0, %v484_v44, %v540_v50  ;;  %v537_v57 = vadd.f32 %v912_v51, %v521_v45  ;;  %v545_v58 = vadd.f32 %v920_v52, %v529_v46 }
 0x1d0   : > { %567 = vst [vmem:[%s1721_s22 + $0x8] sm:$0xff] %v1777_v55  ;;  %575 = vst [vmem:[%s1721_s22 + $0x48] sm:$0xff] %v1781_v56  ;;  %v465_v59 = vpop.f32.mrf.mxu0  ;;  %v497_v60 = vpop.f32.mrf.mxu1 }
 0x1d1   : > { %v1791_v63 = vsel %vm1725_vm0, %v912_v51, %v537_v57  ;;  %v1795_v0 = vsel %vm1725_vm0, %v920_v52, %v545_v58  ;;  %v535_v1 = vadd.f32 %v519_v53, %v465_v59  ;;  %v543_v2 = vadd.f32 %v527_v54, %v497_v60 }
 0x1d2   : > { %572 = vst [vmem:[%s1721_s22 + $0x30] sm:$0xff] %v1791_v63  ;;  %580 = vst [vmem:[%s1721_s22 + $0x70] sm:$0xff] %v1795_v0  ;;  %v913_v3 = vpop.f32.mrf.mxu0  ;;  %v921_v4 = vpop.f32.mrf.mxu1 }
 0x1d3   : > { %v1805_v7 = vsel %vm1725_vm0, %v465_v59, %v535_v1  ;;  %v1809_v8 = vsel %vm1725_vm0, %v497_v60, %v543_v2  ;;  %v538_v9 = vadd.f32 %v913_v3, %v522_v61  ;;  %v546_v10 = vadd.f32 %v921_v4, %v530_v62 }
 0x1d4   : > { %570 = vst [vmem:[%s1721_s22 + $0x20] sm:$0xff] %v1805_v7  ;;  %578 = vst [vmem:[%s1721_s22 + $0x60] sm:$0xff] %v1809_v8  ;;  %v468_v11 = vpop.f32.mrf.mxu0  ;;  %v500_v12 = vpop.f32.mrf.mxu1  ;;  %586 = sbr.rel (%p869_p6) target bundleno = 722 (0x2d2), region = 48 }
 0x1d5   : > { %v1817_v13 = vsel %vm1725_vm0, %v913_v3, %v538_v9  ;;  %v1821_v14 = vsel %vm1725_vm0, %v921_v4, %v546_v10  ;;  %v536_v15 = vadd.f32 %v520_v5, %v468_v11  ;;  %v544_v16 = vadd.f32 %v528_v6, %v500_v12 }
 0x1d6   : > { %573 = vst [vmem:[%s1721_s22 + $0x38] sm:$0xff] %v1817_v13  ;;  %581 = vst [vmem:[%s1721_s22 + $0x78] sm:$0xff] %v1821_v14 }
 0x1d7   : > { %v555_v17 = vsel %vm1725_vm0, %v468_v11, %v536_v15  ;;  %v1831_v18 = vsel %vm1725_vm0, %v500_v12, %v544_v16 }
 0x1d8   : > { %571 = vst [vmem:[%s1721_s22 + $0x28] sm:$0xff] %v555_v17  ;;  %579 = vst [vmem:[%s1721_s22 + $0x68] sm:$0xff] %v1831_v18 }
 0x1d9   : > { %v587_v19 = vmul.f32 %v1749_v39, %v1749_v39  ;;  %v588_v20 = vmul.f32 %v1777_v55, %v1777_v55  ;;  %v589_v22 = vmul.f32 %v1735_v31, %v1735_v31  ;;  %v590_v21 = vmul.f32 %v1763_v47, %v1763_v47 }
 0x1da   : > { %v627_v24 = vlaneseq  ;;  %v591_v25 = vmul.f32 %v1805_v7, %v1805_v7  ;;  %v592_v28 = vmul.f32 %v555_v17, %v555_v17  ;;  %v593_v30 = vmul.f32 %v1791_v63, %v1791_v63 }
 0x1db   : > { %v603_v23 = vadd.f32 %v588_v20, %v587_v19  ;;  %v594_v36 = vmul.f32 %v1817_v13, %v1817_v13  ;;  %v595_v41 = vmul.f32 %v1753_v40, %v1753_v40  ;;  %v596_v44 = vmul.f32 %v1781_v56, %v1781_v56 }
 0x1dc   : > { %v1847_v27 = vshrl.u32 %v627_v24, 7  ;;  %v1852_v35 = vand.u32 127, %v627_v24  ;;  %v597_v49 = vmul.f32 %v1739_v32, %v1739_v32  ;;  %v598_v54 = vmul.f32 %v1767_v48, %v1767_v48 }
 0x1dd   : > { %v604_v26 = vadd.f32 %v603_v23, %v589_v22  ;;  %v600_v2 = vmul.f32 %v1831_v18, %v1831_v18  ;;  %v601_v6 = vmul.f32 %v1795_v0, %v1795_v0  ;;  %v602_v12 = vmul.f32 %v1821_v14, %v1821_v14 }
 0x1de   : > { %v629_v34 = vadd.s32 8, %v1847_v27  ;;  %v630_v38 = vadd.s32 16, %v1847_v27  ;;  %v631_v43 = vadd.s32 24, %v1847_v27  ;;  %vm646_vm1 = vcmp.eq.s32.totalorder %v1847_v27, %v1852_v35 }
 0x1df   : > { %v605_v29 = vadd.f32 %v604_v26, %v590_v21  ;;  %v632_v46 = vadd.s32 32, %v1847_v27  ;;  %v662_v51 = vsel %vm646_vm1, %v1749_v39, 0.0  ;;  %v633_v53 = vadd.s32 40, %v1847_v27 }
 0x1e0   : > { %vm647_vm2 = vcmp.eq.s32.totalorder %v629_v34, %v1852_v35  ;;  %vm648_vm3 = vcmp.eq.s32.totalorder %v630_v38, %v1852_v35  ;;  %vm649_vm4 = vcmp.eq.s32.totalorder %v631_v43, %v1852_v35  ;;  %v634_v59 = vadd.s32 48, %v1847_v27 }
 0x1e1   : > { %v606_v33 = vadd.f32 %v605_v29, %v591_v25  ;;  %v663_v52 = vsel %vm647_vm2, %v1777_v55, 0.0  ;;  %v664_v58 = vsel %vm648_vm3, %v1735_v31, 0.0  ;;  %vm650_vm5 = vcmp.eq.s32.totalorder %v632_v46, %v1852_v35 }
 0x1e2   : > { %v678_v60 = vadd.f32 %v663_v52, %v662_v51  ;;  %v599_v39 = vmul.f32 %v1809_v8, %v1809_v8  ;;  %v665_v55 = vsel %vm649_vm4, %v1763_v47, 0.0  ;;  %v635_v62 = vadd.s32 56, %v1847_v27 }
 0x1e3   : > { %v607_v37 = vadd.f32 %v606_v33, %v592_v28  ;;  %vm651_vm6 = vcmp.eq.s32.totalorder %v633_v53, %v1852_v35  ;;  %v666_v3 = vsel %vm650_vm5, %v1805_v7, 0.0  ;;  %v636_v4 = vadd.s32 64, %v1847_v27 }
 0x1e4   : > { %v679_v1 = vadd.f32 %v678_v60, %v664_v58  ;;  %vm652_vm7 = vcmp.eq.s32.totalorder %v634_v59, %v1852_v35  ;;  %v667_v9 = vsel %vm651_vm6, %v555_v17, 0.0  ;;  %v637_v10 = vadd.s32 72, %v1847_v27  ;;  %v711_v60 = vld [vmem:[%s1689_s25] sm:$0xff] }
 0x1e5   : > { %v608_v42 = vadd.f32 %v607_v37, %v593_v30  ;;  %vm653_vm8 = vcmp.eq.s32.totalorder %v635_v62, %v1852_v35  ;;  %v668_v7 = vsel %vm652_vm7, %v1791_v63, 0.0  ;;  %v638_v16 = vadd.s32 80, %v1847_v27 }
 0x1e6   : > { %v680_v5 = vadd.f32 %v679_v1, %v665_v55  ;;  %vm654_vm9 = vcmp.eq.s32.totalorder %v636_v4, %v1852_v35  ;;  %v669_v22 = vsel %vm653_vm8, %v1817_v13, 0.0  ;;  %v639_v17 = vadd.s32 88, %v1847_v27 }
 0x1e7   : > { %v609_v45 = vadd.f32 %v608_v42, %v594_v36  ;;  %vm655_vm10 = vcmp.eq.s32.totalorder %v637_v10, %v1852_v35  ;;  %v670_v24 = vsel %vm654_vm9, %v1753_v40, 0.0  ;;  %v640_v25 = vadd.s32 96, %v1847_v27 }
 0x1e8   : > { %v681_v11 = vadd.f32 %v680_v5, %v666_v3  ;;  %vm656_vm11 = vcmp.eq.s32.totalorder %v638_v16, %v1852_v35  ;;  %v671_v26 = vsel %vm655_vm10, %v1781_v56, 0.0  ;;  %v641_v28 = vadd.s32 104, %v1847_v27 }
 0x1e9   : > { %v610_v50 = vadd.f32 %v609_v45, %v595_v41  ;;  %vm657_vm12 = vcmp.eq.s32.totalorder %v639_v17, %v1852_v35  ;;  %v672_v29 = vsel %vm656_vm11, %v1739_v32, 0.0  ;;  %v642_v30 = vadd.s32 112, %v1847_v27 }
 0x1ea   : > { %v682_v19 = vadd.f32 %v681_v11, %v667_v9  ;;  %vm658_vm13 = vcmp.eq.s32.totalorder %v640_v25, %v1852_v35  ;;  %v673_v33 = vsel %vm657_vm12, %v1767_v48, 0.0  ;;  %v643_v34 = vadd.s32 120, %v1847_v27 }
 0x1eb   : > { %v611_v57 = vadd.f32 %v610_v50, %v596_v44  ;;  %vm659_vm14 = vcmp.eq.s32.totalorder %v641_v28, %v1852_v35  ;;  %v674_v56 = vsel %vm658_vm13, %v1809_v8, 0.0  ;;  %vm660_vm15 = vcmp.eq.s32.totalorder %v642_v30, %v1852_v35 }
 0x1ec   : > { %v683_v21 = vadd.f32 %v682_v19, %v668_v7  ;;  %v675_v38 = vsel %vm659_vm14, %v1831_v18, 0.0  ;;  %vm661_vm0 = vcmp.eq.s32.totalorder %v643_v34, %v1852_v35  ;;  %v676_v41 = vsel %vm660_vm15, %v1795_v0, 0.0 }
 0x1ed   : > { %v612_v61 = vadd.f32 %v611_v57, %v597_v49  ;;  %v677_v48 = vsel %vm661_vm0, %v1821_v14, 0.0  ;;  %v707_v59 = vstv %s1685_s0  ;;  %vm709_vm2 = vcmp.eq.s32.totalorder %v1852_v35, 0 }
 0x1ee   : > { %v684_v63 = vadd.f32 %v683_v21, %v669_v22  ;;  %vm708_vm1 = vcmp.eq.s32.totalorder %v1847_v27, %v707_v59 }
 0x1ef   : > { %v613_v31 = vadd.f32 %v612_v61, %v598_v54  ;;  %vm710_vm3 = vmand %vm708_vm1, %vm709_vm2 }
 0x1f0   : > { %v685_v13 = vadd.f32 %v684_v63, %v670_v24 }
 0x1f1   : > { %v614_v47 = vadd.f32 %v613_v31, %v599_v39 }
 0x1f2   : > { %v686_v40 = vadd.f32 %v685_v13, %v671_v26 }
 0x1f3   : > { %v615_v15 = vadd.f32 %v614_v47, %v600_v2 }
 0x1f4   : > { %v687_v36 = vadd.f32 %v686_v40, %v672_v29 }
 0x1f5   : > { %v616_v20 = vadd.f32 %v615_v15, %v601_v6 }
 0x1f6   : > { %v688_v37 = vadd.f32 %v687_v36, %v673_v33 }
 0x1f7   : > { %v617_v23 = vadd.f32 %v616_v20, %v602_v12 }
 0x1f8   : > { %v689_v32 = vadd.f32 %v688_v37, %v674_v56 }
 0x1f9   : > { %618 = vadd.xlane.f32.xlu0 %v617_v23 }
 0x1fa   : > { %v690_v42 = vadd.f32 %v689_v32, %v675_v38 }
 0x1fc   : > { %v691_v43 = vadd.f32 %v690_v42, %v676_v41 }
 0x1fe   : > { %v692_v44 = vadd.f32 %v691_v43, %v677_v48 }
 0x200   : > { %693 = vadd.xlane.f32.xlu0 %v692_v44 }
 0x282   : > { %v619_v45 = vpop.xlane.xlu0 %618 }
 0x283   : > { %v620_v46 = vrot.slane %v619_v45, 4 }
 0x285   : > { %v621_v8 = vadd.f32 %v620_v46, %v619_v45 }
 0x287   : > { %v622_v49 = vrot.slane %v621_v8, 2 }
 0x289   : > { %v623_v50 = vadd.f32 %v622_v49, %v621_v8  ;;  %v694_v52 = vpop.xlane.xlu0 %693 }
 0x28a   : > { %v695_v53 = vrot.slane %v694_v52, 4 }
 0x28b   : > { %v624_v18 = vrot.slane %v623_v50, 1 }
 0x28c   : > { %v696_v0 = vadd.f32 %v695_v53, %v694_v52 }
 0x28d   : > { %v625_v51 = vadd.f32 %v624_v18, %v623_v50 }
 0x28e   : > { %v697_v54 = vrot.slane %v696_v0, 2 }
 0x28f   : > { %938 = vpush %v625_v51 }
 0x290   : > { %v698_v14 = vadd.f32 %v697_v54, %v696_v0 }
 0x292   : > { %v699_v57 = vrot.slane %v698_v14, 1 }
 0x294   : > { %v700_v58 = vadd.f32 %v699_v57, %v698_v14 }
 0x296   : > { %940 = vpush %v700_v58 }
 0x2c0   : > { %s939_s3 = spop %938 }
 0x2c1   : > { %s705_s13 = smul.f32 2.0, %s939_s3 }
 0x2c7   : > { %s941_s16 = spop %940 }
 0x2c8   : > { %s703_s1 = smul.f32 2.0, %s941_s16 }
 0x2ca   : > { %s704_s14 = ssub.f32 %s939_s3, %s703_s1 }
 0x2cc   : > { %s2072_s14 = smov (!%p702_p7, %s704_s14), %s705_s13 }
 0x2cd   : > { %v712_v39 = vstv %s2072_s14 }
 0x2ce   : > { %v713_v61 = vsel %vm710_vm3, %v712_v39, 0.0 }
 0x2cf   : > { %v714_v55 = vadd.f32 %v713_v61, %v711_v60 }
 0x2d1   : > { %715 = vst [vmem:[%s1689_s25] sm:$0xff] %v714_v55 }
 0x2d2 PF: > { %s871_s2 = sshll.u32 %s1335_s28, 7  ;;  %s2038_s0 = sld [smem:[#allocation34_spill]] }
 0x2d3   : > { %s730_s11 = sshll.u32 %s1689_s25, 4  ;;  %s717_s21 = scalar_lea.sflag [#allocation11], %s260_s17  ;;  %s731_s11 = int_to_ptr.vmem [resolvable:$true] %s730_s11 }
 0x2d4   : > { %s1209_s18 = scalar_lea.vmem %s731_s11, 128  ;;  %p2039_p13 = scmp.ne.s32.totalorder %s2015_s19, 0 }
 0x2d5   : > { %p1210_p9 = scmp.ne.s32.totalorder %s731_s11, %s1209_s18  ;;  %s1355_s7 = smov [#allocation14]  }
 0x2d6   : > { %s1213_s8 = sshll.u32 %s1355_s7, 4  ;;  %s1214_s8 = int_to_ptr.vmem [resolvable:$false] %s1213_s8 }
 0x2d7   : > { %p1211_p4 = pnand %p1210_p9, %p2039_p13  ;;  %s1215_s27 = scalar_lea.vmem %s1214_s8, 256 }
 0x2d8   : > { %s728_s15 = scalar_lea.hbm %s2038_s0, %s871_s2  ;;  %p1216_p1 = scmp.lt.s32.totalorder %s731_s11, %s1214_s8 }
 0x2d9   : > { %p1212_p0 = pneg %p1211_p4  ;;  %p1217_p11 = scmp.lt.s32.totalorder %s1215_s27, %s1209_s18 }
 0x2db   : > { %p1218_p8 = por %p1217_p11, %p1216_p1 }
 0x2dd   : > { %p1219_p5 = pnand %p1218_p8, %p1212_p0 }
 0x2df   : > { %1222 = shalt.err (!%p1219_p5)
}
 0x2e0   : > { %s1223_s28 = scalar_lea.hbm %s728_s15, 128  ;;  %s1227_s9 = scalar_lea.hbm %s2038_s0, 256 }
 0x2e1   : > { %p1224_p2 = scmp.ne.s32.totalorder %s728_s15, %s1223_s28  ;;  %p1228_p12 = scmp.lt.s32.totalorder %s728_s15, %s2038_s0 }
 0x2e2   : > { %p1229_p6 = scmp.lt.s32.totalorder %s1227_s9, %s1223_s28 }
 0x2e3   : > { %p1225_p3 = pnand %p1224_p2, %p2039_p13 }
 0x2e4   : > { %p1230_p7 = por %p1229_p6, %p1228_p12 }
 0x2e5   : > { %p1226_p10 = pneg %p1225_p3 }
 0x2e7   : > { %p1231_p9 = pnand %p1230_p7, %p1226_p10 }
 0x2e9   : > { %1234 = shalt.err (!%p1231_p9)
}
 0x2ea   : > { %954 = dma.vmem_to_hbm [thread:$0]  (%p2039_p13), %s731_s11, 128, %s728_s15, %s717_s21  }
 0x2eb PF: > { %s2040_s16 = sld [smem:[#allocation27_spill]]  ;;  %p2043_p0 = scmp.ge.s32.totalorder %s1343_s30, 2 }
 0x2ec   : > { %s2041_s1 = sld [smem:[#allocation31_spill]] }
 0x2f1   : > { %s742_s13 = sand.u32 1, %s2040_s16  }
 0x2f2   : > { %p2042_p4 = scmp.ne.s32.totalorder %s2041_s1, 0  ;;  %s743_s14 = scalar_lea.sflag [#allocation11], %s742_s13 }
 0x2f4   : > { %p972_p1 = pnand %p2043_p0, %p2042_p4 }
 0x2f6   : > { %p973_p11 = pneg %p972_p1 }
 0x2f8   : > { %1294 = dma.done.wait (%p973_p11), %s743_s14, 128  }
 0x2f9   : > { %1296 = vsyncadd (%p973_p11), %s743_s14, 4294967168  ;;  %s46_s30 = sadd.s32 1, %s1343_s30   ;;  %s2044_s2 = sld [smem:[#allocation28_spill]] }
 0x2fa   : > { %p43_p8 = scmp.ge.s32.totalorder %s46_s30, 4   ;;  %s2045_s21 = sld [smem:[#allocation30_spill]] }
 0x2fb   : > { %s2046_s19 = sld [smem:[#allocation29_spill]]  ;;  %s2048_s4 = smov %s1303_s20 }
 0x2fc   : > { %s2047_s27 = sld [smem:[#allocation32_spill]]  ;;  %s2050_s22 = smov %s1315_s23 }
 0x2fd   : > { %s2051_s23 = smov %s1319_s24  ;;  %s2052_s24 = smov %s1623_s12 }
 0x2fe   : > { %s2053_s25 = smov %s1327_s26  ;;  %s2055_s28 = smov %s1339_s29 }
 0x2ff   : > { %s2049_s20 = smov %s2044_s2  ;;  %s2056_s29 = smov %s2058_s10 }
 0x300   :  { %45 = sbr.rel (!%p43_p8) target bundleno = 58 (0x3a), region = 99 }
 0x301   : > { %s2054_s26 = smov %s2046_s19 }
 0x305   :  { %748 = vsyncpa [#allocation10], 1 }
 0x306   :  { %750 = vsyncpa [#allocation10 + $0x1], 1 }
 0x307   :  { %751 = vsyncpa [#allocation13], 1 }
 0x308   :  { %753 = vsyncpa [#allocation13 + $0x1], 1 }
 0x309   :  { %754 = vsyncpa [#allocation11], 1 }
 0x30a   :  { %756 = vsyncpa [#allocation11 + $0x1], 1 }

</bundles_post_ra>
